<compile_context>
chip_gen: v5e
topology: v5e:2x2
jax: 0.10.0
libtpu: 0.0.40
codegen_flags: <defaults>
</compile_context>

<pallas_src>
import jax
import jax.numpy as jnp
from jax.experimental import pallas as pl
from jax.experimental.pallas import tpu as pltpu

LN_EPS = 1e-5


def _round_up(n, m):
    return ((n + m - 1) // m) * m


def _pick_batch_tile(B, max_tile=512):
    """Large enough to amortize the ~0.35us/step grid overhead, no batch
    padding for small/mid batches, and >=2 grid steps for large batches so
    v7x megacore can shard the 'parallel' batch axis."""
    if B <= max_tile:
        return B                                   # one step, no padding
    return min(max_tile, _round_up(-(-B // 2), 16))  # >=2 steps, 16-row aligned


def _layernorm_f32(h, gamma, beta):
    # Single elementwise pass: var = E[x^2] - mu^2 (both XLU reduces issue
    # back-to-back); rsqrt goes to the EUP slot.
    mu = jnp.mean(h, axis=-1, keepdims=True)
    ms = jnp.mean(h * h, axis=-1, keepdims=True)
    var = jnp.maximum(ms - mu * mu, 0.0)
    return (h - mu) * jax.lax.rsqrt(var + LN_EPS) * gamma + beta


def dqn_kernel(x_ref,
               w1_ref, b1_ref, g1_ref, be1_ref,
               w2_ref, b2_ref, g2_ref, be2_ref,
               w3_ref, b3_ref,
               o_ref):
    # x arrives f32 (no wrapper cast pass); cast to bf16 for the MXU here.
    x = x_ref[...].astype(jnp.bfloat16)

    # fc1 + LayerNorm + ReLU (f32 accumulate, f32 LN/VPU math — v5e-safe)
    h1 = jnp.dot(x, w1_ref[...], preferred_element_type=jnp.float32) + b1_ref[...]
    h1 = _layernorm_f32(h1, g1_ref[...], be1_ref[...])
    h1 = jnp.maximum(h1, 0.0)

    # fc2 + LayerNorm + ReLU
    h2 = jnp.dot(h1.astype(jnp.bfloat16), w2_ref[...],
                 preferred_element_type=jnp.float32) + b2_ref[...]
    h2 = _layernorm_f32(h2, g2_ref[...], be2_ref[...])
    h2 = jnp.maximum(h2, 0.0)

    # dropout: eval-mode identity (PyTorch nn.Dropout is a no-op at inference)
    # TODO(synk): training-mode stochastic dropout (p=0.2) not implemented here.

    # fc3 — output written unpadded (masked vst is fine; write bytes dominate)
    o_ref[...] = (jnp.dot(h2.astype(jnp.bfloat16), w3_ref[...],
                          preferred_element_type=jnp.float32)
                  + b3_ref[...]).astype(o_ref.dtype)


def dqn_forward(x, kernel_params, *, batch_tile=None):
    """Fused DQN forward.

    x: (B, input_dim) float32.
    kernel_params: output of prepare_dqn_params (bf16 weights, f32 rest).
    Returns (B, output_dim) float32.
    """
    (w1, b1, g1, be1, w2, b2, g2, be2, w3, b3) = kernel_params
    B, d_in = x.shape
    h = w1.shape[1]
    h2 = w2.shape[1]
    d_out = w3.shape[1]

    bt = _pick_batch_tile(B) if batch_tile is None else batch_tile
    Bp = _round_up(B, bt)
    if Bp != B:
        x = jnp.pad(x, ((0, Bp - B), (0, 0)))   # only hit for large, unaligned B

    grid = (Bp // bt,)

    def x_map(i):          # batch-tiled arrays
        return (i, 0)

    def rep_map(i):        # grid-invariant parameter blocks (fetched once)
        return (0, 0)

    in_specs = [
        pl.BlockSpec((bt, d_in), x_map),        # x (f32, cast in-kernel)
        pl.BlockSpec((d_in, h), rep_map),       # w1 (bf16)
        pl.BlockSpec((1, h), rep_map),          # b1
        pl.BlockSpec((1, h), rep_map),          # gamma1
        pl.BlockSpec((1, h), rep_map),          # beta1
        pl.BlockSpec((h, h2), rep_map),         # w2 (bf16)
        pl.BlockSpec((1, h2), rep_map),         # b2
        pl.BlockSpec((1, h2), rep_map),         # gamma2
        pl.BlockSpec((1, h2), rep_map),         # beta2
        pl.BlockSpec((h2, d_out), rep_map),     # w3 (bf16, unpadded)
        pl.BlockSpec((1, d_out), rep_map),      # b3 (unpadded)
    ]
    out_spec = pl.BlockSpec((bt, d_out), x_map)

    out = pl.pallas_call(
        dqn_kernel,
        out_shape=jax.ShapeDtypeStruct((Bp, d_out), jnp.float32),
        grid_spec=pltpu.PrefetchScalarGridSpec(
            num_scalar_prefetch=0,
            grid=grid,
            in_specs=in_specs,
            out_specs=out_spec,
        ),
        compiler_params=pltpu.CompilerParams(
            dimension_semantics=("parallel",),
        ),
    )(x, w1, b1, g1, be1, w2, b2, g2, be2, w3, b3)

    return out[:B] if Bp != B else out


def init_dqn_params(key, input_dim, output_dim, hidden_dim=256):
    """f32 parameters matching the PyTorch module (weights stored as (in, out)).
    Linear weights: Xavier-uniform; biases: PyTorch-style uniform; LN: 1/0."""
    def xavier(key, fan_in, fan_out):
        bound = jnp.sqrt(6.0 / (fan_in + fan_out))
        return jax.random.uniform(key, (fan_in, fan_out), jnp.float32, -bound, bound)

    h = hidden_dim
    h2 = hidden_dim // 2
    k1, k2, k3, k4, k5, k6 = jax.random.split(key, 6)

    w1 = xavier(k1, input_dim, h)
    b1 = jax.random.uniform(k4, (1, h), jnp.float32,
                            -1.0 / jnp.sqrt(input_dim), 1.0 / jnp.sqrt(input_dim))
    g1 = jnp.ones((1, h), jnp.float32)
    be1 = jnp.zeros((1, h), jnp.float32)

    w2 = xavier(k2, h, h2)
    b2 = jax.random.uniform(k5, (1, h2), jnp.float32,
                            -1.0 / jnp.sqrt(h), 1.0 / jnp.sqrt(h))
    g2 = jnp.ones((1, h2), jnp.float32)
    be2 = jnp.zeros((1, h2), jnp.float32)

    w3 = xavier(k3, h2, output_dim)
    b3 = jax.random.uniform(k6, (1, output_dim), jnp.float32,
                            -1.0 / jnp.sqrt(h2), 1.0 / jnp.sqrt(h2))

    return (w1, b1, g1, be1, w2, b2, g2, be2, w3, b3)


def prepare_dqn_params(params):
    """One-time conversion of the f32 module params into kernel operands:
    matmul weights -> bf16 (MXU-native); biases / LN params stay f32.
    Hoisted out of dqn_forward so high-frequency forwards pay no per-call
    pad/cast HBM passes."""
    (w1, b1, g1, be1, w2, b2, g2, be2, w3, b3) = params
    return (w1.astype(jnp.bfloat16), b1, g1, be1,
            w2.astype(jnp.bfloat16), b2, g2, be2,
            w3.astype(jnp.bfloat16), b3)


def _ln_ref(h, g, be):
    mu = jnp.mean(h, -1, keepdims=True)
    var = jnp.mean((h - mu) ** 2, -1, keepdims=True)
    return (h - mu) / jnp.sqrt(var + LN_EPS) * g + be


def dqn_reference_f32(x, params):
    """Pure-JAX f32 reference (module semantics)."""
    (w1, b1, g1, be1, w2, b2, g2, be2, w3, b3) = params
    h1 = jnp.maximum(_ln_ref(x @ w1 + b1, g1, be1), 0.0)
    h2 = jnp.maximum(_ln_ref(h1 @ w2 + b2, g2, be2), 0.0)
    return h2 @ w3 + b3


def dqn_reference_mixed(x, params):
    """Reference with the same bf16 matmul operands / f32 accumulation as the kernel."""
    (w1, b1, g1, be1, w2, b2, g2, be2, w3, b3) = params
    bf = lambda a: a.astype(jnp.bfloat16).astype(jnp.float32)
    h1 = jnp.maximum(_ln_ref(bf(x) @ bf(w1) + b1, g1, be1), 0.0)
    h2 = jnp.maximum(_ln_ref(bf(h1) @ bf(w2) + b2, g2, be2), 0.0)
    return bf(h2) @ bf(w3) + b3


if __name__ == "__main__":
    batch = 2
    input_dim = 16
    hidden_dim = 32     # small hidden for the smoke test (module default is 256)
    output_dim = 4

    key = jax.random.PRNGKey(0)
    kx, kp = jax.random.split(key)
    x = jax.random.normal(kx, (batch, input_dim), jnp.float32)
    params = init_dqn_params(kp, input_dim, output_dim, hidden_dim)
    kparams = prepare_dqn_params(params)   # one-time bf16 weight cast

    # --- single-step grid (B <= tile, no padding anywhere) ---
    out = dqn_forward(x, kparams)
    out = jax.block_until_ready(out)
    assert out.shape == (batch, output_dim)

    ref_mixed = dqn_reference_mixed(x, params)
    assert jnp.allclose(out, ref_mixed, atol=5e-3, rtol=5e-3), "mismatch vs mixed ref"
    ref_f32 = dqn_reference_f32(x, params)
    assert jnp.allclose(out, ref_f32, atol=5e-2, rtol=5e-2), "mismatch vs f32 ref"

    # --- multi-step grid + batch-padding path (forced small tile) ---
    big_b = 40
    xb = jax.random.normal(jax.random.PRNGKey(1), (big_b, input_dim), jnp.float32)
    out_b = jax.block_until_ready(dqn_forward(xb, kparams, batch_tile=16))
    assert out_b.shape == (big_b, output_dim)
    ref_b = dqn_reference_mixed(xb, params)
    assert jnp.allclose(out_b, ref_b, atol=5e-3, rtol=5e-3), "mismatch (multi-step)"

    print("KERNEL_OK")
</pallas_src>

<mosaic_0001>
module attributes {stable_mosaic.version = 11 : i64} {
  func.func @dqn_kernel(%arg0: i32, %arg1: memref<2x16xf32, #tpu.memory_space<vmem>>, %arg2: memref<16x32xbf16, #tpu.memory_space<vmem>>, %arg3: memref<1x32xf32, #tpu.memory_space<vmem>>, %arg4: memref<1x32xf32, #tpu.memory_space<vmem>>, %arg5: memref<1x32xf32, #tpu.memory_space<vmem>>, %arg6: memref<32x16xbf16, #tpu.memory_space<vmem>>, %arg7: memref<1x16xf32, #tpu.memory_space<vmem>>, %arg8: memref<1x16xf32, #tpu.memory_space<vmem>>, %arg9: memref<1x16xf32, #tpu.memory_space<vmem>>, %arg10: memref<16x4xbf16, #tpu.memory_space<vmem>>, %arg11: memref<1x4xf32, #tpu.memory_space<vmem>>, %arg12: memref<2x4xf32, #tpu.memory_space<vmem>>) attributes {dimension_semantics = [#tpu.dimension_semantics<parallel>], iteration_bounds = array<i64: 1>, scalar_prefetch = 0 : i64, scratch_operands = 0 : i64, tpu.core_type = #tpu.core_type<tc>, window_params = [{transform_indices = @transform_0, window_bounds = array<i64: 2, 16>}, {pipeline_mode = #tpu.pipeline_mode<synchronous>, transform_indices = @transform_1, window_bounds = array<i64: 16, 32>}, {pipeline_mode = #tpu.pipeline_mode<synchronous>, transform_indices = @transform_2, window_bounds = array<i64: 1, 32>}, {pipeline_mode = #tpu.pipeline_mode<synchronous>, transform_indices = @transform_3, window_bounds = array<i64: 1, 32>}, {pipeline_mode = #tpu.pipeline_mode<synchronous>, transform_indices = @transform_4, window_bounds = array<i64: 1, 32>}, {pipeline_mode = #tpu.pipeline_mode<synchronous>, transform_indices = @transform_5, window_bounds = array<i64: 32, 16>}, {pipeline_mode = #tpu.pipeline_mode<synchronous>, transform_indices = @transform_6, window_bounds = array<i64: 1, 16>}, {pipeline_mode = #tpu.pipeline_mode<synchronous>, transform_indices = @transform_7, window_bounds = array<i64: 1, 16>}, {pipeline_mode = #tpu.pipeline_mode<synchronous>, transform_indices = @transform_8, window_bounds = array<i64: 1, 16>}, {pipeline_mode = #tpu.pipeline_mode<synchronous>, transform_indices = @transform_9, window_bounds = array<i64: 16, 4>}, {pipeline_mode = #tpu.pipeline_mode<synchronous>, transform_indices = @transform_10, window_bounds = array<i64: 1, 4>}, {transform_indices = @transform_11, window_bounds = array<i64: 2, 4>}]} {
    %c0 = arith.constant 0 : index
    %c0_0 = arith.constant 0 : index
    %0 = vector.load %arg1[%c0, %c0_0] : memref<2x16xf32, #tpu.memory_space<vmem>>, vector<2x16xf32>
    %1 = arith.truncf %0 : vector<2x16xf32> to vector<2x16xbf16>
    %c0_1 = arith.constant 0 : index
    %c0_2 = arith.constant 0 : index
    %2 = vector.load %arg2[%c0_1, %c0_2] : memref<16x32xbf16, #tpu.memory_space<vmem>>, vector<16x32xbf16>
    %cst = arith.constant dense<0.000000e+00> : vector<2x32xf32>
    %3 = tpu.matmul %1, %2, %cst {dimension_numbers = #tpu.dot_dimension_numbers<[1], [0], [0], [1], [0, 0, 1, 1], [], []>} : vector<2x16xbf16>, vector<16x32xbf16>, vector<2x32xf32> -> vector<2x32xf32>
    %c0_3 = arith.constant 0 : index
    %c0_4 = arith.constant 0 : index
    %4 = vector.load %arg3[%c0_3, %c0_4] : memref<1x32xf32, #tpu.memory_space<vmem>>, vector<1x32xf32>
    %5 = vector.broadcast %4 : vector<1x32xf32> to vector<2x32xf32>
    %6 = arith.addf %3, %5 : vector<2x32xf32>
    %c0_5 = arith.constant 0 : index
    %c0_6 = arith.constant 0 : index
    %7 = vector.load %arg4[%c0_5, %c0_6] : memref<1x32xf32, #tpu.memory_space<vmem>>, vector<1x32xf32>
    %c0_7 = arith.constant 0 : index
    %c0_8 = arith.constant 0 : index
    %8 = vector.load %arg5[%c0_7, %c0_8] : memref<1x32xf32, #tpu.memory_space<vmem>>, vector<1x32xf32>
    %cst_9 = arith.constant dense<0.000000e+00> : vector<2xf32>
    %9 = vector.multi_reduction <add>, %6, %cst_9 [1] : vector<2x32xf32> to vector<2xf32>
    %10 = vector.shape_cast %9 : vector<2xf32> to vector<2x1xf32>
    %cst_10 = arith.constant 3.200000e+01 : f32
    %11 = vector.broadcast %cst_10 : f32 to vector<2x1xf32>
    %12 = arith.divf %10, %11 : vector<2x1xf32>
    %13 = arith.mulf %6, %6 : vector<2x32xf32>
    %cst_11 = arith.constant dense<0.000000e+00> : vector<2xf32>
    %14 = vector.multi_reduction <add>, %13, %cst_11 [1] : vector<2x32xf32> to vector<2xf32>
    %15 = vector.shape_cast %14 : vector<2xf32> to vector<2x1xf32>
    %cst_12 = arith.constant 3.200000e+01 : f32
    %16 = vector.broadcast %cst_12 : f32 to vector<2x1xf32>
    %17 = arith.divf %15, %16 : vector<2x1xf32>
    %18 = arith.mulf %12, %12 : vector<2x1xf32>
    %19 = arith.subf %17, %18 : vector<2x1xf32>
    %cst_13 = arith.constant 0.000000e+00 : f32
    %20 = vector.broadcast %cst_13 : f32 to vector<2x1xf32>
    %21 = arith.maximumf %19, %20 : vector<2x1xf32>
    %22 = vector.broadcast %12 : vector<2x1xf32> to vector<2x32xf32>
    %23 = arith.subf %6, %22 : vector<2x32xf32>
    %cst_14 = arith.constant 9.99999974E-6 : f32
    %24 = vector.broadcast %cst_14 : f32 to vector<2x1xf32>
    %25 = arith.addf %21, %24 : vector<2x1xf32>
    %26 = math.rsqrt %25 : vector<2x1xf32>
    %27 = vector.broadcast %26 : vector<2x1xf32> to vector<2x32xf32>
    %28 = arith.mulf %23, %27 : vector<2x32xf32>
    %29 = vector.broadcast %7 : vector<1x32xf32> to vector<2x32xf32>
    %30 = arith.mulf %28, %29 : vector<2x32xf32>
    %31 = vector.broadcast %8 : vector<1x32xf32> to vector<2x32xf32>
    %32 = arith.addf %30, %31 : vector<2x32xf32>
    %cst_15 = arith.constant 0.000000e+00 : f32
    %33 = vector.broadcast %cst_15 : f32 to vector<2x32xf32>
    %34 = arith.maximumf %32, %33 : vector<2x32xf32>
    %35 = arith.truncf %34 : vector<2x32xf32> to vector<2x32xbf16>
    %c0_16 = arith.constant 0 : index
    %c0_17 = arith.constant 0 : index
    %36 = vector.load %arg6[%c0_16, %c0_17] : memref<32x16xbf16, #tpu.memory_space<vmem>>, vector<32x16xbf16>
    %cst_18 = arith.constant dense<0.000000e+00> : vector<2x16xf32>
    %37 = tpu.matmul %35, %36, %cst_18 {dimension_numbers = #tpu.dot_dimension_numbers<[1], [0], [0], [1], [0, 0, 1, 1], [], []>} : vector<2x32xbf16>, vector<32x16xbf16>, vector<2x16xf32> -> vector<2x16xf32>
    %c0_19 = arith.constant 0 : index
    %c0_20 = arith.constant 0 : index
    %38 = vector.load %arg7[%c0_19, %c0_20] : memref<1x16xf32, #tpu.memory_space<vmem>>, vector<1x16xf32>
    %39 = vector.broadcast %38 : vector<1x16xf32> to vector<2x16xf32>
    %40 = arith.addf %37, %39 : vector<2x16xf32>
    %c0_21 = arith.constant 0 : index
    %c0_22 = arith.constant 0 : index
    %41 = vector.load %arg8[%c0_21, %c0_22] : memref<1x16xf32, #tpu.memory_space<vmem>>, vector<1x16xf32>
    %c0_23 = arith.constant 0 : index
    %c0_24 = arith.constant 0 : index
    %42 = vector.load %arg9[%c0_23, %c0_24] : memref<1x16xf32, #tpu.memory_space<vmem>>, vector<1x16xf32>
    %cst_25 = arith.constant dense<0.000000e+00> : vector<2xf32>
    %43 = vector.multi_reduction <add>, %40, %cst_25 [1] : vector<2x16xf32> to vector<2xf32>
    %44 = vector.shape_cast %43 : vector<2xf32> to vector<2x1xf32>
    %cst_26 = arith.constant 1.600000e+01 : f32
    %45 = vector.broadcast %cst_26 : f32 to vector<2x1xf32>
    %46 = arith.divf %44, %45 : vector<2x1xf32>
    %47 = arith.mulf %40, %40 : vector<2x16xf32>
    %cst_27 = arith.constant dense<0.000000e+00> : vector<2xf32>
    %48 = vector.multi_reduction <add>, %47, %cst_27 [1] : vector<2x16xf32> to vector<2xf32>
    %49 = vector.shape_cast %48 : vector<2xf32> to vector<2x1xf32>
    %cst_28 = arith.constant 1.600000e+01 : f32
    %50 = vector.broadcast %cst_28 : f32 to vector<2x1xf32>
    %51 = arith.divf %49, %50 : vector<2x1xf32>
    %52 = arith.mulf %46, %46 : vector<2x1xf32>
    %53 = arith.subf %51, %52 : vector<2x1xf32>
    %cst_29 = arith.constant 0.000000e+00 : f32
    %54 = vector.broadcast %cst_29 : f32 to vector<2x1xf32>
    %55 = arith.maximumf %53, %54 : vector<2x1xf32>
    %56 = vector.broadcast %46 : vector<2x1xf32> to vector<2x16xf32>
    %57 = arith.subf %40, %56 : vector<2x16xf32>
    %cst_30 = arith.constant 9.99999974E-6 : f32
    %58 = vector.broadcast %cst_30 : f32 to vector<2x1xf32>
    %59 = arith.addf %55, %58 : vector<2x1xf32>
    %60 = math.rsqrt %59 : vector<2x1xf32>
    %61 = vector.broadcast %60 : vector<2x1xf32> to vector<2x16xf32>
    %62 = arith.mulf %57, %61 : vector<2x16xf32>
    %63 = vector.broadcast %41 : vector<1x16xf32> to vector<2x16xf32>
    %64 = arith.mulf %62, %63 : vector<2x16xf32>
    %65 = vector.broadcast %42 : vector<1x16xf32> to vector<2x16xf32>
    %66 = arith.addf %64, %65 : vector<2x16xf32>
    %cst_31 = arith.constant 0.000000e+00 : f32
    %67 = vector.broadcast %cst_31 : f32 to vector<2x16xf32>
    %68 = arith.maximumf %66, %67 : vector<2x16xf32>
    %69 = arith.truncf %68 : vector<2x16xf32> to vector<2x16xbf16>
    %c0_32 = arith.constant 0 : index
    %c0_33 = arith.constant 0 : index
    %70 = vector.load %arg10[%c0_32, %c0_33] : memref<16x4xbf16, #tpu.memory_space<vmem>>, vector<16x4xbf16>
    %cst_34 = arith.constant dense<0.000000e+00> : vector<2x4xf32>
    %71 = tpu.matmul %69, %70, %cst_34 {dimension_numbers = #tpu.dot_dimension_numbers<[1], [0], [0], [1], [0, 0, 1, 1], [], []>} : vector<2x16xbf16>, vector<16x4xbf16>, vector<2x4xf32> -> vector<2x4xf32>
    %c0_35 = arith.constant 0 : index
    %c0_36 = arith.constant 0 : index
    %72 = vector.load %arg11[%c0_35, %c0_36] : memref<1x4xf32, #tpu.memory_space<vmem>>, vector<1x4xf32>
    %73 = vector.broadcast %72 : vector<1x4xf32> to vector<2x4xf32>
    %74 = arith.addf %71, %73 : vector<2x4xf32>
    %c0_37 = arith.constant 0 : index
    %c0_38 = arith.constant 0 : index
    %75 = vector.load %arg12[%c0_37, %c0_38] : memref<2x4xf32, #tpu.memory_space<vmem>>, vector<2x4xf32>
    tpu.vector_store %arg12[%c0_37, %c0_38], %74 {strides = array<i32>} : memref<2x4xf32, #tpu.memory_space<vmem>>, vector<2x4xf32>,
    return
  }
  func.func @transform_0(%arg0: i32) -> (i32, i32) {
    %c0_i32 = arith.constant 0 : i32
    %c0_i32_0 = arith.constant 0 : i32
    return %arg0, %c0_i32 : i32, i32
  }
  func.func @transform_1(%arg0: i32) -> (i32, i32) {
    %c0_i32 = arith.constant 0 : i32
    %c0_i32_0 = arith.constant 0 : i32
    %c0_i32_1 = arith.constant 0 : i32
    return %c0_i32, %c0_i32_0 : i32, i32
  }
  func.func @transform_2(%arg0: i32) -> (i32, i32) {
    %c0_i32 = arith.constant 0 : i32
    %c0_i32_0 = arith.constant 0 : i32
    %c0_i32_1 = arith.constant 0 : i32
    return %c0_i32, %c0_i32_0 : i32, i32
  }
  func.func @transform_3(%arg0: i32) -> (i32, i32) {
    %c0_i32 = arith.constant 0 : i32
    %c0_i32_0 = arith.constant 0 : i32
    %c0_i32_1 = arith.constant 0 : i32
    return %c0_i32, %c0_i32_0 : i32, i32
  }
  func.func @transform_4(%arg0: i32) -> (i32, i32) {
    %c0_i32 = arith.constant 0 : i32
    %c0_i32_0 = arith.constant 0 : i32
    %c0_i32_1 = arith.constant 0 : i32
    return %c0_i32, %c0_i32_0 : i32, i32
  }
  func.func @transform_5(%arg0: i32) -> (i32, i32) {
    %c0_i32 = arith.constant 0 : i32
    %c0_i32_0 = arith.constant 0 : i32
    %c0_i32_1 = arith.constant 0 : i32
    return %c0_i32, %c0_i32_0 : i32, i32
  }
  func.func @transform_6(%arg0: i32) -> (i32, i32) {
    %c0_i32 = arith.constant 0 : i32
    %c0_i32_0 = arith.constant 0 : i32
    %c0_i32_1 = arith.constant 0 : i32
    return %c0_i32, %c0_i32_0 : i32, i32
  }
  func.func @transform_7(%arg0: i32) -> (i32, i32) {
    %c0_i32 = arith.constant 0 : i32
    %c0_i32_0 = arith.constant 0 : i32
    %c0_i32_1 = arith.constant 0 : i32
    return %c0_i32, %c0_i32_0 : i32, i32
  }
  func.func @transform_8(%arg0: i32) -> (i32, i32) {
    %c0_i32 = arith.constant 0 : i32
    %c0_i32_0 = arith.constant 0 : i32
    %c0_i32_1 = arith.constant 0 : i32
    return %c0_i32, %c0_i32_0 : i32, i32
  }
  func.func @transform_9(%arg0: i32) -> (i32, i32) {
    %c0_i32 = arith.constant 0 : i32
    %c0_i32_0 = arith.constant 0 : i32
    %c0_i32_1 = arith.constant 0 : i32
    return %c0_i32, %c0_i32_0 : i32, i32
  }
  func.func @transform_10(%arg0: i32) -> (i32, i32) {
    %c0_i32 = arith.constant 0 : i32
    %c0_i32_0 = arith.constant 0 : i32
    %c0_i32_1 = arith.constant 0 : i32
    return %c0_i32, %c0_i32_0 : i32, i32
  }
  func.func @transform_11(%arg0: i32) -> (i32, i32) {
    %c0_i32 = arith.constant 0 : i32
    %c0_i32_0 = arith.constant 0 : i32
    return %arg0, %c0_i32 : i32, i32
  }
}

</mosaic_0001>

<bundles_post_ra>
// kernel: tpu_custom_call.1
= control target key start
LH: loop header
LB: loop body
LE: loop exit
PB: predicated region body
PF: predicated region fallthrough
CT: control target
= control target key end

     0   :  { %vm54_vm0 = vcmask 130048   ;;  %s415_s0 = inlined_call_operand.vmem [shape: f32[2,16], index: 0, kind: input, shape index: {}]   ;;  %s416_s1 = inlined_call_operand.vmem [shape: bf16[16,32], index: 1, kind: input, shape index: {}]   ;;  %s417_s2 = inlined_call_operand.vmem [shape: f32[1,32], index: 2, kind: input, shape index: {}]   ;;  %s418_s3 = inlined_call_operand.vmem [shape: f32[1,32], index: 3, kind: input, shape index: {}]   ;;  %s419_s4 = inlined_call_operand.vmem [shape: f32[1,32], index: 4, kind: input, shape index: {}]   ;;  %s420_s5 = inlined_call_operand.vmem [shape: bf16[32,16], index: 5, kind: input, shape index: {}]   ;;  %s421_s6 = inlined_call_operand.vmem [shape: f32[1,16], index: 6, kind: input, shape index: {}]   ;;  %s422_s7 = inlined_call_operand.vmem [shape: f32[1,16], index: 7, kind: input, shape index: {}]   ;;  %s423_s8 = inlined_call_operand.vmem [shape: f32[1,16], index: 8, kind: input, shape index: {}]   ;;  %s424_s9 = inlined_call_operand.vmem [shape: bf16[16,4], index: 9, kind: input, shape index: {}]   ;;  %s425_s10 = inlined_call_operand.vmem [shape: f32[1,4], index: 10, kind: input, shape index: {}]   ;;  %s426_s11 = inlined_call_operand.hbm [shape: f32[2,4], index: 11, kind: output, shape index: {}]  }
   0x1   :  { %v263_v0 = vld [vmem:[%s416_s1] sm:$0xff] }
   0x2   :  { %v40_v1 = vld [vmem:[%s415_s0] sm:$0x3]  ;;  %65 = vmatpush.bf16.msra.mxu0 %v263_v0 }
   0x3   :  { %v41_v2 = vpack.c.bf16 %v40_v1, %v40_v1 }
   0x4   :  { %16 = vsyncpa [#allocation3], 0  ;;  %v270_v3 = vld [vmem:[%s417_s2] ss:$0 sm:$0xff]  ;;  %vm73_vm1 = vcmask 254976   ;;  %v311_v10 = vmov 32.0  }
   0x5   :  { %248 = vmatmul.msk.bf16.vlgmr.msra.gmra.mxu0 %vm54_vm0, %v41_v2  ;;  %277 = vrcp.f32 %v311_v10  ;;  %v265_v17 = vld [vmem:[%s420_s5 + $0x8] sm:$0xff]  ;;  %v264_v19 = vld [vmem:[%s420_s5] sm:$0xff]  ;;  %vm136_vm6 = vcmask 261120   ;;  %vm155_vm7 = vcmask 123904   ;;  %v312_v49 = vmov 16.0   ;;  %s313_s14 = smov [#allocation2]  }
   0x6   :  { %146 = vmatpush.bf16.msra.mxu1 %v265_v17  ;;  %v271_v34 = vld [vmem:[%s418_s3] ss:$0 sm:$0xff]  ;;  %s233_s15 = sshll.u32 %s313_s14, 4  ;;  %s235_s17 = sshll.u32 %s426_s11, 4  ;;  %vm226_vm12 = vcmask 25600   ;;  %s234_s15 = int_to_ptr.vmem [resolvable:$true] %s233_s15  ;;  %s236_s17 = int_to_ptr.hbm [resolvable:$true] %s235_s17 }
   0x7   :  { %v272_v37 = vld [vmem:[%s419_s4] ss:$0 sm:$0xff] }
   0x8   :  { %v273_v42 = vld [vmem:[%s421_s6] ss:$0 sm:$0xff] }
   0x9   :  { %v266_v56 = vld [vmem:[%s424_s9] sm:$0xff] }
   0xa   :  { %147 = vmatpush.bf16.msra.mxu1 %v264_v19  ;;  %220 = vmatpush.bf16.msra.mxu2 %v266_v56 }
   0xb   :  { %v278_v11 = vpop.eup %277 }
   0xc   :  { %v78_v12 = vmul.f32 32.0, %v278_v11  ;;  %vm82_vm2 = vweird.f32 %v278_v11 }
   0xe   :  { %v79_v13 = vsub.f32 1.0, %v78_v12 }
  0x10   :  { %v80_v14 = vmul.f32 %v278_v11, %v79_v13 }
  0x12   :  { %v81_v15 = vadd.f32 %v278_v11, %v80_v14 }
  0x14   :  { %v83_v18 = vsel %vm82_vm2, %v278_v11, %v81_v15  ;;  %v275_v11 = vld [vmem:[%s423_s8] ss:$0 sm:$0xff] }
  0x82   :  { %v67_v4 = vpop.f32.mrf.mxu0 }
  0x83   :  { %v68_v5 = vadd.f32 %v270_v3, %v67_v4 }
  0x85   :  { %v74_v6 = vsel %vm73_vm1, %v68_v5, 0.0  ;;  %v85_v7 = vmul.f32 %v68_v5, %v68_v5 }
  0x86   :  { %75 = vadd.xlane.f32.xlu0 %v74_v6 }
  0x87   :  { %v86_v9 = vsel %vm73_vm1, %v85_v7, 0.0 }
  0x8a   :  { %v69_v8 = vpop.f32.mrf.mxu0 }
  0x8b   :  { %v274_v8 = vld [vmem:[%s422_s7] ss:$0 sm:$0xff] }
  0x8e   :  { %87 = vadd.xlane.f32.xlu0 %v86_v9 }
  0xf9   :  { %v76_v16 = vpop.xlane.xlu0 %75 }
  0xfa   :  { %v84_v20 = vmul.f32 %v83_v18, %v76_v16  ;;  %v276_v16 = vld [vmem:[%s425_s10] ss:$0 sm:$0xff] }
  0xfc   :  { %v90_v22 = vmul.f32 %v84_v20, %v84_v20  ;;  %v93_v33 = vsub.f32 %v68_v5, %v84_v20 }
 0x101   :  { %v88_v21 = vpop.xlane.xlu0 %87 }
 0x102   :  { %v89_v23 = vmul.f32 %v88_v21, %v83_v18 }
 0x104   :  { %v91_v24 = vsub.f32 %v89_v23, %v90_v22 }
 0x106   :  { %v92_v25 = vmax.f32 %v91_v24, 0.0 }
 0x108   :  { %v94_v26 = vadd.f32 1e-05, %v92_v25 }
 0x10a   :  { %279 = vrsqrt.f32 %v94_v26  ;;  %vm101_vm4 = vweird.f32 %v94_v26 }
 0x10b   :  { %281 = vrcp.f32 %v312_v49 }
 0x110   :  { %v280_v27 = vpop.eup %279 }
 0x111   :  { %v96_v28 = vmul.f32 %v280_v27, %v94_v26  ;;  %vm102_vm3 = vweird.f32 %v280_v27  ;;  %v282_v50 = vpop.eup %281 }
 0x112   :  { %vm103_vm5 = vmor %vm101_vm4, %vm102_vm3  ;;  %v160_v51 = vmul.f32 16.0, %v282_v50  ;;  %vm164_vm8 = vweird.f32 %v282_v50 }
 0x113   :  { %v97_v29 = vmul.f32 %v280_v27, %v96_v28 }
 0x114   :  { %v161_v52 = vsub.f32 1.0, %v160_v51 }
 0x115   :  { %v98_v30 = vmul.f32 0.5, %v97_v29 }
 0x116   :  { %v162_v53 = vmul.f32 %v282_v50, %v161_v52 }
 0x117   :  { %v99_v31 = vsub.f32 1.5, %v98_v30 }
 0x118   :  { %v163_v54 = vadd.f32 %v282_v50, %v162_v53 }
 0x119   :  { %v100_v32 = vmul.f32 %v280_v27, %v99_v31 }
 0x11a   :  { %v165_v57 = vsel %vm164_vm8, %v282_v50, %v163_v54 }
 0x11b   :  { %v104_v35 = vsel %vm103_vm5, %v280_v27, %v100_v32 }
 0x11c   :  { %v105_v36 = vmul.f32 %v104_v35, %v93_v33 }
 0x11e   :  { %v109_v38 = vmul.f32 %v271_v34, %v105_v36 }
 0x120   :  { %v113_v39 = vadd.f32 %v272_v37, %v109_v38 }
 0x122   :  { %v114_v40 = vmax.f32 %v113_v39, 0.0 }
 0x124   :  { %v115_v41 = vpack.c.bf16 %v114_v40, %v114_v40 }
 0x126   :  { %257 = vmatmul.msk.bf16.vlgmr.msra.gmra.mxu1 %vm136_vm6, %v115_v41 }
 0x1a3   :  { %v149_v43 = vpop.f32.mrf.mxu1 }
 0x1a4   :  { %v150_v44 = vadd.f32 %v273_v42, %v149_v43 }
 0x1a6   :  { %v156_v45 = vsel %vm155_vm7, %v150_v44, 0.0  ;;  %v167_v46 = vmul.f32 %v150_v44, %v150_v44 }
 0x1a7   :  { %157 = vadd.xlane.f32.xlu1 %v156_v45 }
 0x1a8   :  { %v168_v48 = vsel %vm155_vm7, %v167_v46, 0.0 }
 0x1ab   :  { %v151_v47 = vpop.f32.mrf.mxu1 }
 0x1af   :  { %169 = vadd.xlane.f32.xlu1 %v168_v48 }
 0x21a   :  { %v158_v55 = vpop.xlane.xlu1 %157 }
 0x21b   :  { %v166_v58 = vmul.f32 %v165_v57, %v158_v55 }
 0x21d   :  { %v172_v60 = vmul.f32 %v166_v58, %v166_v58  ;;  %v175_v7 = vsub.f32 %v150_v44, %v166_v58 }
 0x222   :  { %v170_v59 = vpop.xlane.xlu1 %169 }
 0x223   :  { %v171_v61 = vmul.f32 %v170_v59, %v165_v57 }
 0x225   :  { %v173_v62 = vsub.f32 %v171_v61, %v172_v60 }
 0x227   :  { %v174_v63 = vmax.f32 %v173_v62, 0.0 }
 0x229   :  { %v176_v0 = vadd.f32 1e-05, %v174_v63 }
 0x22b   :  { %283 = vrsqrt.f32 %v176_v0  ;;  %vm183_vm10 = vweird.f32 %v176_v0 }
 0x231   :  { %v284_v1 = vpop.eup %283 }
 0x232   :  { %v178_v2 = vmul.f32 %v284_v1, %v176_v0  ;;  %vm184_vm9 = vweird.f32 %v284_v1 }
 0x233   :  { %vm185_vm11 = vmor %vm183_vm10, %vm184_vm9 }
 0x234   :  { %v179_v3 = vmul.f32 %v284_v1, %v178_v2 }
 0x236   :  { %v180_v4 = vmul.f32 0.5, %v179_v3 }
 0x238   :  { %v181_v5 = vsub.f32 1.5, %v180_v4 }
 0x23a   :  { %v182_v6 = vmul.f32 %v284_v1, %v181_v5 }
 0x23c   :  { %v186_v9 = vsel %vm185_vm11, %v284_v1, %v182_v6 }
 0x23d   :  { %v187_v10 = vmul.f32 %v186_v9, %v175_v7 }
 0x23f   :  { %v191_v12 = vmul.f32 %v274_v8, %v187_v10 }
 0x241   :  { %v195_v13 = vadd.f32 %v275_v11, %v191_v12 }
 0x243   :  { %v196_v14 = vmax.f32 %v195_v13, 0.0 }
 0x245   :  { %v197_v15 = vpack.c.bf16 %v196_v14, %v196_v14 }
 0x247   :  { %262 = vmatmul.msk.bf16.vlgmr.msra.gmra.mxu2 %vm54_vm0, %v197_v15 }
 0x2ca   :  { %v222_v17 = vpop.f32.mrf.mxu2 }
 0x2cb   :  { %v223_v18 = vadd.f32 %v276_v16, %v222_v17 }
 0x2cd   :  { %227 = vst.msk [vmem:[#allocation2] sm:$0x3] %vm226_vm12, %v223_v18 }
 0x2ce   :  { %238 = dma.vmem_to_hbm [thread:$0]  %s234_s15, 32, %s236_s17, [#allocation3]  }
 0x2d2   :  { %v224_v19 = vpop.f32.mrf.mxu2 }
 0x2d3   :  { %309 = dma.done.wait [#allocation3], 32  }
 0x2d4   :  { %310 = vsyncadd [#allocation3], 4294967264 }
 0x2d5   :  { %243 = vsyncpa [#allocation3], 1 }

</bundles_post_ra>
